<compile_context>
chip_gen: v5e
topology: v5e:2x2
jax: 0.10.0
libtpu: 0.0.40
codegen_flags: <defaults>
</compile_context>

<pallas_src>
import jax
import jax.numpy as jnp
from jax import lax
from jax.experimental import pallas as pl
from jax.experimental.pallas import tpu as pltpu

EPS = 1e-5
DROP_P = 0.5
LANE = 128     # vreg lane width: keep last (feature) axis a multiple of this
SUBLANE = 8    # vreg sublane width


def _round_up(v, m):
    return ((v + m - 1) // m) * m


def proto_net_kernel(x_ref, w_ref, b_ref, gamma_ref, beta_ref, mask_ref, o_ref):
    # ---- Linear: [N, Dp] @ [Dp, Hp] + [1, Hp]  (MXU, f32 accumulate) ----
    # TODO(synk): for large D_in/H on v6e/v7x cast x/W to bf16 here (keep f32 accum).
    h = jnp.dot(x_ref[...], w_ref[...], preferred_element_type=jnp.float32)
    h = h + b_ref[...]

    # ---- BatchNorm1d (training mode: biased batch statistics over axis 0) ----
    n = h.shape[0]
    inv_n = 1.0 / n
    mean = jnp.sum(h, axis=0, keepdims=True) * inv_n
    diff = h - mean
    var = jnp.sum(diff * diff, axis=0, keepdims=True) * inv_n
    h_bn = diff * lax.rsqrt(var + EPS) * gamma_ref[...] + beta_ref[...]

    # ---- ReLU ----
    h_relu = jnp.maximum(h_bn, 0.0)

    # ---- Dropout(p=0.5), train mode: pre-scaled multiplicative mask {1/(1-p), 0} ----
    o_ref[...] = (h_relu * mask_ref[...]).astype(o_ref.dtype)


def prototypical_network_forward(x, w, b, gamma, beta, dropout_key):
    """x: [N, D_in] f32; w: [D_in, H] f32; b/gamma/beta: [H] or [1, H] f32.

    Returns dropout(relu(batchnorm_train(x @ w + b))) with p=0.5, shape [N, H].
    """
    x = jnp.asarray(x, jnp.float32)
    w = jnp.asarray(w, jnp.float32)
    n, d_in = x.shape
    hidden = w.shape[1]

    # Pad feature axes to lane-dense multiples of 128 (zero-padding is exact for the
    # matmul; padded hidden columns produce 0 because gamma/beta pads are 0 and are
    # sliced off below).  Batch stays un-padded so BN statistics are exact.
    d_pad = _round_up(d_in, LANE)
    h_pad = _round_up(hidden, LANE)

    x_p = jnp.zeros((n, d_pad), jnp.float32).at[:, :d_in].set(x)
    w_p = jnp.zeros((d_pad, h_pad), jnp.float32).at[:d_in, :hidden].set(w)
    b_p = jnp.zeros((1, h_pad), jnp.float32).at[0, :hidden].set(jnp.ravel(b))
    g_p = jnp.zeros((1, h_pad), jnp.float32).at[0, :hidden].set(jnp.ravel(gamma))
    be_p = jnp.zeros((1, h_pad), jnp.float32).at[0, :hidden].set(jnp.ravel(beta))

    # Pre-scaled dropout mask: keep -> 1/(1-p), drop -> 0.  Generated outside the
    # kernel (works on TPU and in interpret mode); deterministic given dropout_key.
    keep = jax.random.bernoulli(dropout_key, p=1.0 - DROP_P, shape=(n, h_pad))
    mask = keep.astype(jnp.float32) * (1.0 / (1.0 - DROP_P))

    y_pad = pl.pallas_call(
        proto_net_kernel,
        out_shape=jax.ShapeDtypeStruct((n, h_pad), jnp.float32),
        in_specs=[
            pl.BlockSpec(memory_space=pltpu.VMEM),   # x (padded)
            pl.BlockSpec(memory_space=pltpu.VMEM),   # w (padded)
            pl.BlockSpec(memory_space=pltpu.VMEM),   # bias
            pl.BlockSpec(memory_space=pltpu.VMEM),   # gamma
            pl.BlockSpec(memory_space=pltpu.VMEM),   # beta
            pl.BlockSpec(memory_space=pltpu.VMEM),   # dropout mask
        ],
        out_specs=pl.BlockSpec(memory_space=pltpu.VMEM),
    )(x_p, w_p, b_p, g_p, be_p, mask)

    # TODO(synk): at realistic sizes (N >> 8), tile the batch with a grid +
    # accumulator-based BN statistics instead of a single whole-array block.
    return y_pad[:, :hidden]


if __name__ == "__main__":
    # Small shapes consistent with the module: batch=8, input_dim=32, hidden_dim=32.
    N, D_IN, HIDDEN = 8, 32, 32

    key = jax.random.PRNGKey(0)
    kx, kw, kb, kd = jax.random.split(key, 4)

    x = jax.random.normal(kx, (N, D_IN), dtype=jnp.float32)

    # Deterministic parameter init (shapes from nn.Linear / nn.BatchNorm1d).
    bound = 1.0 / (D_IN ** 0.5)
    w = jax.random.uniform(kw, (D_IN, HIDDEN), minval=-bound, maxval=bound,
                           dtype=jnp.float32)                  # Linear weight (transposed)
    b = jax.random.uniform(kb, (HIDDEN,), minval=-bound, maxval=bound,
                           dtype=jnp.float32)                  # Linear bias
    gamma = jnp.ones((HIDDEN,), dtype=jnp.float32)             # BN weight
    beta = jnp.zeros((HIDDEN,), dtype=jnp.float32)             # BN bias

    y = prototypical_network_forward(x, w, b, gamma, beta, kd)
    jax.block_until_ready(y)
    assert y.shape == (N, HIDDEN) and y.dtype == jnp.float32
    assert bool(jnp.all(jnp.isfinite(y)))
    print("KERNEL_OK")
</pallas_src>

<mosaic_0001>
module attributes {stable_mosaic.version = 11 : i64} {
  func.func @proto_net_kernel(%arg0: memref<8x128xf32, #tpu.memory_space<vmem>>, %arg1: memref<128x128xf32, #tpu.memory_space<vmem>>, %arg2: memref<1x128xf32, #tpu.memory_space<vmem>>, %arg3: memref<1x128xf32, #tpu.memory_space<vmem>>, %arg4: memref<1x128xf32, #tpu.memory_space<vmem>>, %arg5: memref<8x128xf32, #tpu.memory_space<vmem>>, %arg6: memref<8x128xf32, #tpu.memory_space<vmem>>) attributes {dimension_semantics = [], scalar_prefetch = 0 : i64, scratch_operands = 0 : i64, tpu.core_type = #tpu.core_type<tc>} {
    %c0 = arith.constant 0 : index
    %c0_0 = arith.constant 0 : index
    %0 = vector.load %arg0[%c0, %c0_0] : memref<8x128xf32, #tpu.memory_space<vmem>>, vector<8x128xf32>
    %c0_1 = arith.constant 0 : index
    %c0_2 = arith.constant 0 : index
    %1 = vector.load %arg1[%c0_1, %c0_2] : memref<128x128xf32, #tpu.memory_space<vmem>>, vector<128x128xf32>
    %cst = arith.constant dense<0.000000e+00> : vector<8x128xf32>
    %2 = tpu.matmul %0, %1, %cst {dimension_numbers = #tpu.dot_dimension_numbers<[1], [0], [0], [1], [0, 0, 1, 1], [], []>} : vector<8x128xf32>, vector<128x128xf32>, vector<8x128xf32> -> vector<8x128xf32>
    %c0_3 = arith.constant 0 : index
    %c0_4 = arith.constant 0 : index
    %3 = vector.load %arg2[%c0_3, %c0_4] : memref<1x128xf32, #tpu.memory_space<vmem>>, vector<1x128xf32>
    %4 = vector.broadcast %3 : vector<1x128xf32> to vector<8x128xf32>
    %5 = arith.addf %2, %4 : vector<8x128xf32>
    %cst_5 = arith.constant dense<0.000000e+00> : vector<128xf32>
    %6 = vector.multi_reduction <add>, %5, %cst_5 [0] : vector<8x128xf32> to vector<128xf32>
    %7 = vector.shape_cast %6 : vector<128xf32> to vector<1x128xf32>
    %cst_6 = arith.constant 1.250000e-01 : f32
    %8 = vector.broadcast %cst_6 : f32 to vector<1x128xf32>
    %9 = arith.mulf %7, %8 : vector<1x128xf32>
    %10 = vector.broadcast %9 : vector<1x128xf32> to vector<8x128xf32>
    %11 = arith.subf %5, %10 : vector<8x128xf32>
    %12 = arith.mulf %11, %11 : vector<8x128xf32>
    %cst_7 = arith.constant dense<0.000000e+00> : vector<128xf32>
    %13 = vector.multi_reduction <add>, %12, %cst_7 [0] : vector<8x128xf32> to vector<128xf32>
    %14 = vector.shape_cast %13 : vector<128xf32> to vector<1x128xf32>
    %cst_8 = arith.constant 1.250000e-01 : f32
    %15 = vector.broadcast %cst_8 : f32 to vector<1x128xf32>
    %16 = arith.mulf %14, %15 : vector<1x128xf32>
    %cst_9 = arith.constant 9.99999974E-6 : f32
    %17 = vector.broadcast %cst_9 : f32 to vector<1x128xf32>
    %18 = arith.addf %16, %17 : vector<1x128xf32>
    %19 = math.rsqrt %18 : vector<1x128xf32>
    %20 = vector.broadcast %19 : vector<1x128xf32> to vector<8x128xf32>
    %21 = arith.mulf %11, %20 : vector<8x128xf32>
    %c0_10 = arith.constant 0 : index
    %c0_11 = arith.constant 0 : index
    %22 = vector.load %arg3[%c0_10, %c0_11] : memref<1x128xf32, #tpu.memory_space<vmem>>, vector<1x128xf32>
    %23 = vector.broadcast %22 : vector<1x128xf32> to vector<8x128xf32>
    %24 = arith.mulf %21, %23 : vector<8x128xf32>
    %c0_12 = arith.constant 0 : index
    %c0_13 = arith.constant 0 : index
    %25 = vector.load %arg4[%c0_12, %c0_13] : memref<1x128xf32, #tpu.memory_space<vmem>>, vector<1x128xf32>
    %26 = vector.broadcast %25 : vector<1x128xf32> to vector<8x128xf32>
    %27 = arith.addf %24, %26 : vector<8x128xf32>
    %cst_14 = arith.constant 0.000000e+00 : f32
    %28 = vector.broadcast %cst_14 : f32 to vector<8x128xf32>
    %29 = arith.maximumf %27, %28 : vector<8x128xf32>
    %c0_15 = arith.constant 0 : index
    %c0_16 = arith.constant 0 : index
    %30 = vector.load %arg5[%c0_15, %c0_16] : memref<8x128xf32, #tpu.memory_space<vmem>>, vector<8x128xf32>
    %31 = arith.mulf %29, %30 : vector<8x128xf32>
    %c0_17 = arith.constant 0 : index
    %c0_18 = arith.constant 0 : index
    %32 = vector.load %arg6[%c0_17, %c0_18] : memref<8x128xf32, #tpu.memory_space<vmem>>, vector<8x128xf32>
    tpu.vector_store %arg6[%c0_17, %c0_18], %31 {strides = array<i32>} : memref<8x128xf32, #tpu.memory_space<vmem>>, vector<8x128xf32>,
    return
  }
}

</mosaic_0001>

<bundles_post_ra>
// kernel: tpu_custom_call.1
= control target key start
LH: loop header
LB: loop body
LE: loop exit
PB: predicated region body
PF: predicated region fallthrough
CT: control target
= control target key end

     0   :  { %11 = vsyncpa [#allocation3], 0  ;;  %s343_s0 = inlined_call_operand.hbm [shape: f32[8,128], index: 0, kind: input, shape index: {}]   ;;  %s344_s1 = inlined_call_operand.hbm [shape: f32[128,128], index: 1, kind: input, shape index: {}]   ;;  %s345_s2 = inlined_call_operand.vmem [shape: f32[1,128], index: 2, kind: input, shape index: {}]   ;;  %s346_s3 = inlined_call_operand.vmem [shape: f32[1,128], index: 3, kind: input, shape index: {}]   ;;  %s347_s4 = inlined_call_operand.vmem [shape: f32[1,128], index: 4, kind: input, shape index: {}]   ;;  %s348_s5 = inlined_call_operand.hbm [shape: f32[8,128], index: 5, kind: input, shape index: {}]   ;;  %s349_s6 = inlined_call_operand.hbm [shape: f32[8,128], index: 6, kind: output, shape index: {}]  }
   0x1   :  { %12 = vsyncpa [#allocation6], 0  ;;  %s29_s23 = sshll.u32 %s344_s1, 4  ;;  %s30_s23 = int_to_ptr.hbm [resolvable:$true] %s29_s23 }
   0x2   :  { %13 = vsyncpa [#allocation4], 0  ;;  %s281_s24 = smov [#allocation5]   ;;  %s19_s28 = sshll.u32 %s343_s0, 4  ;;  %s20_s28 = int_to_ptr.hbm [resolvable:$true] %s19_s28 }
   0x3   :  { %s31_s25 = sshll.u32 %s281_s24, 4  ;;  %s282_s29 = smov 128   ;;  %s32_s25 = int_to_ptr.vmem [resolvable:$true] %s31_s25 }
   0x4   :  { %s283_s30 = smov 8   ;;  %s284_s7 = smov [#allocation2]  }
   0x5   :  { %37 = dma.hbm_to_vmem [thread:$0]  %s30_s23, 2048, %s32_s25, [#allocation6], %s282_s29, %s282_s29, %s283_s30  }
   0x6   :  { %s21_s8 = sshll.u32 %s284_s7, 4  ;;  %s49_s11 = sshll.u32 %s348_s5, 4  ;;  %s22_s8 = int_to_ptr.vmem [resolvable:$true] %s21_s8  ;;  %s50_s11 = int_to_ptr.hbm [resolvable:$true] %s49_s11 }
   0x7   :  { %24 = dma.hbm_to_vmem [thread:$0]  %s20_s28, 128, %s22_s8, [#allocation3]  }
   0x8   :  { %s285_s1 = smov [#allocation7]  }
   0x9   :  { %s51_s12 = sshll.u32 %s285_s1, 4  ;;  %s52_s12 = int_to_ptr.vmem [resolvable:$true] %s51_s12 }
   0xa   :  { %54 = dma.hbm_to_vmem [thread:$0]  %s50_s11, 128, %s52_s12, [#allocation6]  }
   0xb   :  { %275 = dma.done.wait [#allocation3], 128  }
   0xc   :  { %276 = vsyncadd [#allocation3], 4294967168 }
   0xd   :  { %277 = dma.done.wait [#allocation6], 2176  }
   0xe   :  { %278 = vsyncadd [#allocation6], 4294965120  ;;  %v83_v0 = vld [vmem:[#allocation5 + $0x78] sm:$0xff]  ;;  %v82_v1 = vld [vmem:[#allocation5 + $0x70] sm:$0xff]  ;;  %s286_s16 = smov [#allocation8]   ;;  %s157_s20 = sshll.u32 %s349_s6, 4  ;;  %s158_s20 = int_to_ptr.hbm [resolvable:$true] %s157_s20 }
   0xf   :  { %88 = vmatpush.msra.mxu0 %v83_v0  ;;  %v81_v2 = vld [vmem:[#allocation5 + $0x68] sm:$0xff]  ;;  %v80_v3 = vld [vmem:[#allocation5 + $0x60] sm:$0xff]  ;;  %v79_v4 = vld [vmem:[#allocation5 + $0x58] sm:$0xff]  ;;  %s155_s17 = sshll.u32 %s286_s16, 4  ;;  %s156_s17 = int_to_ptr.vmem [resolvable:$true] %s155_s17 }
  0x10   :  { %v78_v5 = vld [vmem:[#allocation5 + $0x50] sm:$0xff]  ;;  %v77_v6 = vld [vmem:[#allocation5 + $0x48] sm:$0xff]  ;;  %v76_v7 = vld [vmem:[#allocation5 + $0x40] sm:$0xff] }
  0x11   :  { %89 = vmatpush.msra.mxu0 %v82_v1  ;;  %v75_v8 = vld [vmem:[#allocation5 + $0x38] sm:$0xff]  ;;  %v74_v9 = vld [vmem:[#allocation5 + $0x30] sm:$0xff]  ;;  %v73_v10 = vld [vmem:[#allocation5 + $0x28] sm:$0xff] }
  0x12   :  { %v72_v11 = vld [vmem:[#allocation5 + $0x20] sm:$0xff]  ;;  %v71_v12 = vld [vmem:[#allocation5 + $0x18] sm:$0xff]  ;;  %v70_v13 = vld [vmem:[#allocation5 + $0x10] sm:$0xff] }
  0x13   :  { %90 = vmatpush.msra.mxu0 %v81_v2  ;;  %v69_v14 = vld [vmem:[#allocation5 + $0x8] sm:$0xff]  ;;  %v68_v15 = vld [vmem:[#allocation5] sm:$0xff]  ;;  %v67_v16 = vld [vmem:[#allocation2] sm:$0xff] }
  0x14   :  { %v174_v17 = vld [vmem:[%s345_s2] ss:$0 sm:$0xff]  ;;  %v147_v49 = vld [vmem:[#allocation7] sm:$0xff] }
  0x15   :  { %91 = vmatpush.msra.mxu0 %v80_v3  ;;  %v175_v43 = vld [vmem:[%s346_s3] ss:$0 sm:$0xff] }
  0x16   :  { %v176_v46 = vld [vmem:[%s347_s4] ss:$0 sm:$0xff] }
  0x17   :  { %92 = vmatpush.msra.mxu0 %v79_v4 }
  0x19   :  { %93 = vmatpush.msra.mxu0 %v78_v5 }
  0x1b   :  { %94 = vmatpush.msra.mxu0 %v77_v6 }
  0x1d   :  { %95 = vmatpush.msra.mxu0 %v76_v7 }
  0x1f   :  { %96 = vmatpush.msra.mxu0 %v75_v8 }
  0x21   :  { %97 = vmatpush.msra.mxu0 %v74_v9 }
  0x23   :  { %98 = vmatpush.msra.mxu0 %v73_v10 }
  0x25   :  { %99 = vmatpush.msra.mxu0 %v72_v11 }
  0x27   :  { %100 = vmatpush.msra.mxu0 %v71_v12 }
  0x29   :  { %101 = vmatpush.msra.mxu0 %v70_v13 }
  0x2b   :  { %102 = vmatpush.msra.mxu0 %v69_v14 }
  0x2d   :  { %103 = vmatpush.msra.mxu0 %v68_v15 }
  0x2e   :  { %104 = vmatmul.f32.vlgmr.msra.gmra.mxu0 %v67_v16 }
  0xab   :  { %v105_v18 = vpop.f32.mrf.mxu0 }
  0xac   :  { %v106_v19 = vadd.f32 %v174_v17, %v105_v18 }
  0xae   :  { %v108_v20 = vrot.slane %v106_v19, 4 }
  0xb0   :  { %v109_v21 = vadd.f32 %v108_v20, %v106_v19 }
  0xb2   :  { %v110_v22 = vrot.slane %v109_v21, 2 }
  0xb4   :  { %v111_v23 = vadd.f32 %v110_v22, %v109_v21 }
  0xb6   :  { %v112_v24 = vrot.slane %v111_v23, 1 }
  0xb8   :  { %v113_v25 = vadd.f32 %v112_v24, %v111_v23 }
  0xba   :  { %v114_v26 = vmul.f32 0.125, %v113_v25 }
  0xbc   :  { %v115_v27 = vsub.f32 %v106_v19, %v114_v26 }
  0xbe   :  { %v116_v28 = vmul.f32 %v115_v27, %v115_v27 }
  0xc0   :  { %v117_v29 = vrot.slane %v116_v28, 4 }
  0xc2   :  { %v118_v30 = vadd.f32 %v117_v29, %v116_v28 }
  0xc4   :  { %v119_v31 = vrot.slane %v118_v30, 2 }
  0xc6   :  { %v120_v32 = vadd.f32 %v119_v31, %v118_v30 }
  0xc8   :  { %v121_v33 = vrot.slane %v120_v32, 1 }
  0xca   :  { %v122_v34 = vadd.f32 %v121_v33, %v120_v32 }
  0xcc   :  { %v123_v35 = vmul.f32 0.125, %v122_v34 }
  0xce   :  { %v124_v36 = vadd.f32 1e-05, %v123_v35 }
  0xd0   :  { %177 = vrsqrt.f32 %v124_v36  ;;  %vm131_vm1 = vweird.f32 %v124_v36 }
  0xd6   :  { %v178_v37 = vpop.eup %177 }
  0xd7   :  { %v126_v38 = vmul.f32 %v178_v37, %v124_v36  ;;  %vm132_vm0 = vweird.f32 %v178_v37 }
  0xd8   :  { %vm133_vm2 = vmor %vm131_vm1, %vm132_vm0 }
  0xd9   :  { %v127_v39 = vmul.f32 %v178_v37, %v126_v38 }
  0xdb   :  { %v128_v40 = vmul.f32 0.5, %v127_v39 }
  0xdd   :  { %v129_v41 = vsub.f32 1.5, %v128_v40 }
  0xdf   :  { %v130_v42 = vmul.f32 %v178_v37, %v129_v41 }
  0xe1   :  { %v134_v44 = vsel %vm133_vm2, %v178_v37, %v130_v42 }
  0xe2   :  { %v135_v45 = vmul.f32 %v134_v44, %v115_v27 }
  0xe4   :  { %v140_v47 = vmul.f32 %v175_v43, %v135_v45 }
  0xe6   :  { %v145_v48 = vadd.f32 %v176_v46, %v140_v47 }
  0xe8   :  { %v146_v50 = vmax.f32 %v145_v48, 0.0 }
  0xea   :  { %v148_v51 = vmul.f32 %v147_v49, %v146_v50 }
  0xec   :  { %149 = vst [vmem:[#allocation8] sm:$0xff] %v148_v51 }
  0xed   :  { %160 = dma.vmem_to_hbm [thread:$0]  %s156_s17, 128, %s158_s20, [#allocation4]  }
  0xee   :  { %279 = dma.done.wait [#allocation4], 128  }
  0xef   :  { %280 = vsyncadd [#allocation4], 4294967168 }
  0xf0   :  { %165 = vsyncpa [#allocation3], 1 }
  0xf1   :  { %166 = vsyncpa [#allocation6], 1 }
  0xf2   :  { %167 = vsyncpa [#allocation4], 1 }

</bundles_post_ra>
